<compile_context>
chip_gen: v5e
topology: v5e:2x2
jax: 0.10.0
libtpu: 0.0.40
codegen_flags: <defaults>
</compile_context>

<pallas_src>
import numpy as np
import jax
import jax.numpy as jnp
from jax.experimental import pallas as pl
from jax.experimental.pallas import tpu as pltpu

LOOK_BACK = 6
INPUT_FEATURES_NUM = 2 * LOOK_BACK + 1  # 13

GP = 128          # lane pitch of one packed gate block
R_OFF = 0         # r gate lanes [0, H)      of block 0
Z_OFF = GP // 2   # z gate lanes [64, 64+H)  of block 0  (roll by GP/2 is direction-proof)
N_OFF = GP        # n gate lanes [0, H)      of block 1


def _round_up(x, m):
    return (x + m - 1) // m * m


def _cdiv(a, b):
    return (a + b - 1) // b


# -----------------------------------------------------------------------------
# Packed-parameter layout + host-side packer
# -----------------------------------------------------------------------------
def _layout(num_layers, input_feats, hidden, out_size):
    """Static row offsets inside the packed (rows, 2*GP) parameter slab."""
    fp_rows = _round_up(input_feats, 8)            # layer-0 K rows (incl. zero e-row + pad)
    hp_rows = _round_up(hidden, 8)                 # deeper-layer K rows (32 for H=32)
    w_offsets = [0]
    for l in range(1, num_layers):
        w_offsets.append(fp_rows + hp_rows * (l - 1))
    bias_off = fp_rows + hp_rows * (num_layers - 1)  # 8-row block per layer: [gate bias, b_hh_n]
    lin_off = bias_off + 8 * num_layers              # out_size rows of w_h
    lin_e_row = lin_off + out_size                   # row of per-output e-weights
    lin_b_row = lin_e_row + 1                        # row of per-output biases
    total = _round_up(lin_b_row + 1, 8)
    return dict(w_offsets=tuple(w_offsets), bias_off=bias_off, lin_off=lin_off,
                lin_e_row=lin_e_row, lin_b_row=lin_b_row, total_rows=total,
                fp_rows=fp_rows, hp_rows=hp_rows)


def pack_params(params, input_feats, hidden, out_size):
    """Pack all weights/biases (PyTorch-native shapes) into one f32 slab (rows, 256)."""
    H = hidden
    assert H <= GP // 2, "gate repacking requires hidden_size <= 64"
    gru = params["gru"]
    L = len(gru)
    lay = _layout(L, input_feats, H, out_size)
    slab = np.zeros((lay["total_rows"], 2 * GP), np.float32)

    for l, (w_ih, _w_hh, b_ih, b_hh) in enumerate(gru):     # w_hh never shipped (h_0 == 0)
        w_ih = np.asarray(w_ih)                              # (3H, in_dim), rows = [r; z; n]
        b_ih = np.asarray(b_ih)                              # (3H,)
        b_hh = np.asarray(b_hh)                              # (3H,)
        in_dim = w_ih.shape[1]
        off = lay["w_offsets"][l]
        for g, col in enumerate((R_OFF, Z_OFF, N_OFF)):      # r | z | n lane offsets
            slab[off:off + in_dim, col:col + H] = w_ih[g * H:(g + 1) * H, :].T
        br = lay["bias_off"] + 8 * l
        slab[br, R_OFF:R_OFF + H] = b_ih[0:H] + b_hh[0:H]              # r bias (folded)
        slab[br, Z_OFF:Z_OFF + H] = b_ih[H:2 * H] + b_hh[H:2 * H]      # z bias (folded)
        slab[br, N_OFF:N_OFF + H] = b_ih[2 * H:3 * H]                  # n bias, input part
        slab[br + 1, 0:H] = b_hh[2 * H:3 * H]                          # n bias, hidden part (scaled by r)

    w_lin, b_lin = params["lin"]                              # (O, H+1), (O,)
    w_lin = np.asarray(w_lin)
    b_lin = np.asarray(b_lin)
    for o in range(out_size):
        slab[lay["lin_off"] + o, 0:H] = w_lin[o, 0:H]         # hidden part of Linear row o
    slab[lay["lin_e_row"], 0:out_size] = w_lin[:, H]          # e weight per output
    slab[lay["lin_b_row"], 0:out_size] = b_lin                # bias per output
    return slab, lay


# -----------------------------------------------------------------------------
# Pallas kernel
# -----------------------------------------------------------------------------
def make_kernel(lay, num_layers, input_feats, hidden, out_size):
    w_offsets = lay["w_offsets"]
    bias_off = lay["bias_off"]
    lin_off = lay["lin_off"]
    lin_e_row = lay["lin_e_row"]
    lin_b_row = lay["lin_b_row"]
    fp_rows = lay["fp_rows"]
    hp_rows = lay["hp_rows"]
    e_col = input_feats - 1
    H = hidden

    def kernel(x_ref, p_ref, out_ref):
        x = x_ref[...]                                       # (TB, fp_rows) f32
        e = x[:, e_col:e_col + 1]                            # (TB, 1) last real feature

        # Stacked GRU, single time step, h_0 = 0.  Layer-0 weight block has zero rows
        # for the e-lane and the feature padding, so x can be fed whole.
        g_in = x
        k_rows = fp_rows
        for l in range(num_layers):
            w = p_ref[pl.ds(w_offsets[l], k_rows), :]        # (k_rows, 2*GP)
            gi = jnp.dot(g_in, w, preferred_element_type=jnp.float32)   # (TB, 2*GP)
            gi = gi + p_ref[pl.ds(bias_off + 8 * l, 1), :]   # folded biases, (1, 2*GP)

            sig = jax.nn.sigmoid(gi[:, 0:GP])                # r @ lanes 0:H, z @ lanes 64:64+H
            b_hn = p_ref[pl.ds(bias_off + 8 * l + 1, 1), pl.ds(0, GP)]   # (1, GP), b_hh_n @ 0:H
            n = jnp.tanh(gi[:, GP:2 * GP] + sig * b_hn)      # nonzero only on lanes 0:H
            # Bring z to lanes 0:H; shift == GP/2 so the rotate is direction-agnostic.
            z = pltpu.roll(sig, GP // 2, axis=1)
            h = (1.0 - z) * n                                # (TB, GP); lanes >= H exactly 0
            g_in = h[:, 0:hp_rows]                           # (TB, 32) feeds next layer / head
            k_rows = hp_rows

        # Final Linear on concat([h, e]): VPU multiply + lane reduction per output column
        # (avoids a 1-column MXU matmul).
        cols = []
        for o in range(out_size):
            w_row = p_ref[pl.ds(lin_off + o, 1), pl.ds(0, hp_rows)]    # (1, hp_rows)
            w_e = p_ref[pl.ds(lin_e_row, 1), pl.ds(o, 1)]              # (1, 1)
            b_o = p_ref[pl.ds(lin_b_row, 1), pl.ds(o, 1)]              # (1, 1)
            cols.append(jnp.sum(g_in * w_row, axis=-1, keepdims=True) + e * w_e + b_o)
        out = cols[0] if out_size == 1 else jnp.concatenate(cols, axis=-1)
        out_ref[...] = out.astype(out_ref.dtype)
        # TODO(synk): lane-dense (out, tb) store epilogue for very large batch counts.

    return kernel


# -----------------------------------------------------------------------------
# Forward builder (packs params once, returns jitted forward)
# -----------------------------------------------------------------------------
def make_forward(params, input_size, hidden_size, output_size, num_layers,
                 max_batch_tile=512):
    slab_np, lay = pack_params(params, input_size, hidden_size, output_size)
    slab = jnp.asarray(slab_np)
    fp_rows = lay["fp_rows"]
    kernel = make_kernel(lay, num_layers, input_size, hidden_size, output_size)
    mbt = max(8, (max_batch_tile // 8) * 8)

    def fwd(x_input):
        S, B, F = x_input.shape
        assert S == 1, "module's e-reshape / cat requires seq_len == 1"
        assert F == input_size
        x0 = x_input[0].astype(jnp.float32)                  # (B, F)

        # Batch tile: multiple of 8, capped by max_batch_tile, and at least 2 tiles
        # once the padded batch reaches 16 so the "parallel" axis spans both
        # TensorCores on v7x (harmless on single-TC v5e/v6e).
        Bp0 = _round_up(B, 8)
        half = _round_up(_cdiv(Bp0, 2), 8)
        tb = min(Bp0, mbt, max(8, half))
        Bp = _round_up(B, tb)

        # Pad batch to a tile multiple and features to the padded layer-0 K (16);
        # padded weight rows are zero, so the padding is exact.
        x0 = jnp.pad(x0, ((0, Bp - B), (0, fp_rows - F)))

        out = pl.pallas_call(
            kernel,
            out_shape=jax.ShapeDtypeStruct((Bp, output_size), jnp.float32),
            grid=(Bp // tb,),
            in_specs=[
                pl.BlockSpec((tb, fp_rows), lambda i: (i, 0)),          # batch-tiled input
                # Constant block index ⇒ the ~72 KB slab is DMA'd once and stays resident.
                pl.BlockSpec(slab.shape, lambda i: (0, 0)),
            ],
            out_specs=pl.BlockSpec((tb, output_size), lambda i: (i, 0)),
            compiler_params=pltpu.CompilerParams(
                dimension_semantics=("parallel",)),
        )(x0, slab)
        return out[:B].reshape(S, B, output_size)

    return jax.jit(fwd)


# -----------------------------------------------------------------------------
# Deterministic parameter init (PyTorch-native shapes and uniform bounds)
# -----------------------------------------------------------------------------
def init_params(key, input_size, hidden_size, output_size, num_layers):
    gru_in = input_size - 1
    bound_h = 1.0 / np.sqrt(hidden_size)
    layers = []
    k = key
    for l in range(num_layers):
        in_dim = gru_in if l == 0 else hidden_size
        k, k1, k2, k3, k4 = jax.random.split(k, 5)
        w_ih = jax.random.uniform(k1, (3 * hidden_size, in_dim), jnp.float32, -bound_h, bound_h)
        w_hh = jax.random.uniform(k2, (3 * hidden_size, hidden_size), jnp.float32, -bound_h, bound_h)
        b_ih = jax.random.uniform(k3, (3 * hidden_size,), jnp.float32, -bound_h, bound_h)
        b_hh = jax.random.uniform(k4, (3 * hidden_size,), jnp.float32, -bound_h, bound_h)
        layers.append((w_ih, w_hh, b_ih, b_hh))
    k, k5, k6 = jax.random.split(k, 3)
    bound_l = 1.0 / np.sqrt(hidden_size + 1)
    w_lin = jax.random.uniform(k5, (output_size, hidden_size + 1), jnp.float32, -bound_l, bound_l)
    b_lin = jax.random.uniform(k6, (output_size,), jnp.float32, -bound_l, bound_l)
    return {"gru": layers, "lin": (w_lin, b_lin)}


# -----------------------------------------------------------------------------
# Pure-JAX reference (mirrors the PyTorch forward exactly, INCLUDING the w_hh
# recurrence with h_0 = 0 — validates the kernel's dead-matmul elimination and
# the dense gate repacking).
# -----------------------------------------------------------------------------
def reference_forward(x_input, params):
    S, B, F = x_input.shape
    x = x_input[:, :, 0:F - 1].astype(jnp.float32)
    e = x_input[:, :, F - 1].reshape(S, B, 1)
    H = params["gru"][0][1].shape[1]
    seq = x
    for (w_ih, w_hh, b_ih, b_hh) in params["gru"]:
        h = jnp.zeros((B, H), jnp.float32)
        outs = []
        for t in range(S):
            gi = seq[t] @ w_ih.T + b_ih
            gh = h @ w_hh.T + b_hh
            r = jax.nn.sigmoid(gi[:, 0:H] + gh[:, 0:H])
            z = jax.nn.sigmoid(gi[:, H:2 * H] + gh[:, H:2 * H])
            n = jnp.tanh(gi[:, 2 * H:] + r * gh[:, 2 * H:])
            h = (1.0 - z) * n + z * h
            outs.append(h)
        seq = jnp.stack(outs, axis=0)
    cat = jnp.concatenate([seq, e], axis=2)                  # (S, B, H+1)
    w_lin, b_lin = params["lin"]
    out = cat.reshape(S * B, H + 1) @ w_lin.T + b_lin
    return out.reshape(S, B, -1)


# -----------------------------------------------------------------------------
if __name__ == "__main__":
    input_size = INPUT_FEATURES_NUM   # 13
    hidden_size = 32
    output_size = 1
    num_layers = 2
    seq, batch = 1, 8                 # seq must be 1 (module constraint)

    key = jax.random.PRNGKey(0)
    k_params, k_data = jax.random.split(key)
    params = init_params(k_params, input_size, hidden_size, output_size, num_layers)
    x_input = jax.random.normal(k_data, (seq, batch, INPUT_FEATURES_NUM), jnp.float32)

    forward = make_forward(params, input_size, hidden_size, output_size, num_layers)
    out = jax.block_until_ready(forward(x_input))

    ref = jax.block_until_ready(reference_forward(x_input, params))
    assert out.shape == (seq, batch, output_size)
    assert np.allclose(np.asarray(out), np.asarray(ref), rtol=1e-5, atol=1e-5)

    print("KERNEL_OK")
</pallas_src>

<mosaic_0001>
module attributes {stable_mosaic.version = 11 : i64} {
  func.func @kernel(%arg0: i32, %arg1: memref<8x16xf32, #tpu.memory_space<vmem>>, %arg2: memref<72x256xf32, #tpu.memory_space<vmem>>, %arg3: memref<8x1xf32, #tpu.memory_space<vmem>>) attributes {dimension_semantics = [#tpu.dimension_semantics<parallel>], iteration_bounds = array<i64: 1>, scalar_prefetch = 0 : i64, scratch_operands = 0 : i64, tpu.core_type = #tpu.core_type<tc>, window_params = [{transform_indices = @transform_0, window_bounds = array<i64: 8, 16>}, {pipeline_mode = #tpu.pipeline_mode<synchronous>, transform_indices = @transform_1, window_bounds = array<i64: 72, 256>}, {transform_indices = @transform_2, window_bounds = array<i64: 8, 1>}]} {
    %c0 = arith.constant 0 : index
    %c0_0 = arith.constant 0 : index
    %0 = vector.load %arg1[%c0, %c0_0] : memref<8x16xf32, #tpu.memory_space<vmem>>, vector<8x16xf32>
    %1 = vector.extract_strided_slice %0 {offsets = [0, 12], sizes = [8, 1], strides = [1, 1]} : vector<8x16xf32> to vector<8x1xf32>
    %c0_1 = arith.constant 0 : index
    %c0_2 = arith.constant 0 : index
    %2 = vector.load %arg2[%c0_1, %c0_2] : memref<72x256xf32, #tpu.memory_space<vmem>>, vector<16x256xf32>
    %cst = arith.constant dense<0.000000e+00> : vector<8x256xf32>
    %3 = tpu.matmul %0, %2, %cst {dimension_numbers = #tpu.dot_dimension_numbers<[1], [0], [0], [1], [0, 0, 1, 1], [], []>} : vector<8x16xf32>, vector<16x256xf32>, vector<8x256xf32> -> vector<8x256xf32>
    %c48 = arith.constant 48 : index
    %c0_3 = arith.constant 0 : index
    %4 = vector.load %arg2[%c48, %c0_3] : memref<72x256xf32, #tpu.memory_space<vmem>>, vector<1x256xf32>
    %5 = vector.broadcast %4 : vector<1x256xf32> to vector<8x256xf32>
    %6 = arith.addf %3, %5 : vector<8x256xf32>
    %7 = vector.extract_strided_slice %6 {offsets = [0, 0], sizes = [8, 128], strides = [1, 1]} : vector<8x256xf32> to vector<8x128xf32>
    %8 = arith.negf %7 : vector<8x128xf32>
    %9 = math.exp %8 : vector<8x128xf32>
    %cst_4 = arith.constant 1.000000e+00 : f32
    %10 = vector.broadcast %cst_4 : f32 to vector<8x128xf32>
    %11 = arith.addf %10, %9 : vector<8x128xf32>
    %12 = arith.divf %10, %11 : vector<8x128xf32>
    %c49 = arith.constant 49 : index
    %c0_5 = arith.constant 0 : index
    %13 = vector.load %arg2[%c49, %c0_5] : memref<72x256xf32, #tpu.memory_space<vmem>>, vector<1x128xf32>
    %14 = vector.extract_strided_slice %6 {offsets = [0, 128], sizes = [8, 128], strides = [1, 1]} : vector<8x256xf32> to vector<8x128xf32>
    %15 = vector.broadcast %13 : vector<1x128xf32> to vector<8x128xf32>
    %16 = arith.mulf %12, %15 : vector<8x128xf32>
    %17 = arith.addf %14, %16 : vector<8x128xf32>
    %18 = math.tanh %17 : vector<8x128xf32>
    %c64_i32 = arith.constant 64 : i32
    %19 = tpu.dynamic_rotate %12 by %c64_i32 dim 1 : vector<8x128xf32>, i32 -> vector<8x128xf32>
    %cst_6 = arith.constant 1.000000e+00 : f32
    %20 = vector.broadcast %cst_6 : f32 to vector<8x128xf32>
    %21 = arith.subf %20, %19 : vector<8x128xf32>
    %22 = arith.mulf %21, %18 : vector<8x128xf32>
    %23 = vector.extract_strided_slice %22 {offsets = [0, 0], sizes = [8, 32], strides = [1, 1]} : vector<8x128xf32> to vector<8x32xf32>
    %c16 = arith.constant 16 : index
    %c0_7 = arith.constant 0 : index
    %24 = vector.load %arg2[%c16, %c0_7] : memref<72x256xf32, #tpu.memory_space<vmem>>, vector<32x256xf32>
    %cst_8 = arith.constant dense<0.000000e+00> : vector<8x256xf32>
    %25 = tpu.matmul %23, %24, %cst_8 {dimension_numbers = #tpu.dot_dimension_numbers<[1], [0], [0], [1], [0, 0, 1, 1], [], []>} : vector<8x32xf32>, vector<32x256xf32>, vector<8x256xf32> -> vector<8x256xf32>
    %c56 = arith.constant 56 : index
    %c0_9 = arith.constant 0 : index
    %26 = vector.load %arg2[%c56, %c0_9] : memref<72x256xf32, #tpu.memory_space<vmem>>, vector<1x256xf32>
    %27 = vector.broadcast %26 : vector<1x256xf32> to vector<8x256xf32>
    %28 = arith.addf %25, %27 : vector<8x256xf32>
    %29 = vector.extract_strided_slice %28 {offsets = [0, 0], sizes = [8, 128], strides = [1, 1]} : vector<8x256xf32> to vector<8x128xf32>
    %30 = arith.negf %29 : vector<8x128xf32>
    %31 = math.exp %30 : vector<8x128xf32>
    %cst_10 = arith.constant 1.000000e+00 : f32
    %32 = vector.broadcast %cst_10 : f32 to vector<8x128xf32>
    %33 = arith.addf %32, %31 : vector<8x128xf32>
    %34 = arith.divf %32, %33 : vector<8x128xf32>
    %c57 = arith.constant 57 : index
    %c0_11 = arith.constant 0 : index
    %35 = vector.load %arg2[%c57, %c0_11] : memref<72x256xf32, #tpu.memory_space<vmem>>, vector<1x128xf32>
    %36 = vector.extract_strided_slice %28 {offsets = [0, 128], sizes = [8, 128], strides = [1, 1]} : vector<8x256xf32> to vector<8x128xf32>
    %37 = vector.broadcast %35 : vector<1x128xf32> to vector<8x128xf32>
    %38 = arith.mulf %34, %37 : vector<8x128xf32>
    %39 = arith.addf %36, %38 : vector<8x128xf32>
    %40 = math.tanh %39 : vector<8x128xf32>
    %c64_i32_12 = arith.constant 64 : i32
    %41 = tpu.dynamic_rotate %34 by %c64_i32_12 dim 1 : vector<8x128xf32>, i32 -> vector<8x128xf32>
    %cst_13 = arith.constant 1.000000e+00 : f32
    %42 = vector.broadcast %cst_13 : f32 to vector<8x128xf32>
    %43 = arith.subf %42, %41 : vector<8x128xf32>
    %44 = arith.mulf %43, %40 : vector<8x128xf32>
    %45 = vector.extract_strided_slice %44 {offsets = [0, 0], sizes = [8, 32], strides = [1, 1]} : vector<8x128xf32> to vector<8x32xf32>
    %c64 = arith.constant 64 : index
    %c0_14 = arith.constant 0 : index
    %46 = vector.load %arg2[%c64, %c0_14] : memref<72x256xf32, #tpu.memory_space<vmem>>, vector<1x32xf32>
    %c65 = arith.constant 65 : index
    %c0_15 = arith.constant 0 : index
    %47 = vector.load %arg2[%c65, %c0_15] : memref<72x256xf32, #tpu.memory_space<vmem>>, vector<1x1xf32>
    %c66 = arith.constant 66 : index
    %c0_16 = arith.constant 0 : index
    %48 = vector.load %arg2[%c66, %c0_16] : memref<72x256xf32, #tpu.memory_space<vmem>>, vector<1x1xf32>
    %49 = vector.broadcast %46 : vector<1x32xf32> to vector<8x32xf32>
    %50 = arith.mulf %45, %49 : vector<8x32xf32>
    %cst_17 = arith.constant dense<0.000000e+00> : vector<8xf32>
    %51 = vector.multi_reduction <add>, %50, %cst_17 [1] : vector<8x32xf32> to vector<8xf32>
    %52 = vector.shape_cast %51 : vector<8xf32> to vector<8x1xf32>
    %53 = vector.broadcast %47 : vector<1x1xf32> to vector<8x1xf32>
    %54 = arith.mulf %1, %53 : vector<8x1xf32>
    %55 = arith.addf %52, %54 : vector<8x1xf32>
    %56 = vector.broadcast %48 : vector<1x1xf32> to vector<8x1xf32>
    %57 = arith.addf %55, %56 : vector<8x1xf32>
    %c0_18 = arith.constant 0 : index
    %c0_19 = arith.constant 0 : index
    %58 = vector.load %arg3[%c0_18, %c0_19] : memref<8x1xf32, #tpu.memory_space<vmem>>, vector<8x1xf32>
    tpu.vector_store %arg3[%c0_18, %c0_19], %57 {strides = array<i32>} : memref<8x1xf32, #tpu.memory_space<vmem>>, vector<8x1xf32>,
    return
  }
  func.func @transform_0(%arg0: i32) -> (i32, i32) {
    %c0_i32 = arith.constant 0 : i32
    %c0_i32_0 = arith.constant 0 : i32
    return %arg0, %c0_i32 : i32, i32
  }
  func.func @transform_1(%arg0: i32) -> (i32, i32) {
    %c0_i32 = arith.constant 0 : i32
    %c0_i32_0 = arith.constant 0 : i32
    %c0_i32_1 = arith.constant 0 : i32
    return %c0_i32, %c0_i32_0 : i32, i32
  }
  func.func @transform_2(%arg0: i32) -> (i32, i32) {
    %c0_i32 = arith.constant 0 : i32
    %c0_i32_0 = arith.constant 0 : i32
    return %arg0, %c0_i32 : i32, i32
  }
}

</mosaic_0001>

<bundles_post_ra>
// kernel: fwd.1
= control target key start
LH: loop header
LB: loop body
LE: loop exit
PB: predicated region body
PF: predicated region fallthrough
CT: control target
= control target key end

     0   :  { %7 = vsyncpa [#allocation3], 0  ;;  %s275_s12 = smov [#allocation2]   ;;  %s276_s14 = smov 256   ;;  %s315_s0 = inlined_call_operand.vmem [shape: f32[8,16], index: 0, kind: input, shape index: {}]   ;;  %s316_s1 = inlined_call_operand.hbm [shape: f32[72,256], index: 1, kind: input, shape index: {}]   ;;  %s317_s2 = inlined_call_operand.vmem [shape: f32[8,1], index: 2, kind: output, shape index: {}]  }
   0x1   :  { %s14_s11 = sshll.u32 %s316_s1, 4  ;;  %s16_s13 = sshll.u32 %s275_s12, 4  ;;  %s15_s11 = int_to_ptr.hbm [resolvable:$true] %s14_s11  ;;  %s17_s13 = int_to_ptr.vmem [resolvable:$true] %s16_s13 }
   0x2   :  { %s277_s15 = smov 16  }
   0x3   :  { %22 = dma.hbm_to_vmem [thread:$0]  %s15_s11, 2304, %s17_s13, [#allocation3], %s276_s14, %s276_s14, %s277_s15  }
   0x4   :  { %273 = dma.done.wait [#allocation3], 2304  }
   0x5   :  { %274 = vsyncadd [#allocation3], 4294964992  ;;  %v30_v0 = vld [vmem:[#allocation2 + $0x10] sm:$0xff]  ;;  %v28_v1 = vld [vmem:[#allocation2] sm:$0xff]  ;;  %vm39_vm0 = vcmask 130048   ;;  %vm125_vm5 = vcmask 261120  }
   0x6   :  { %57 = vmatpush.msra.mxu0 %v30_v0  ;;  %v302_v2 = vld [vmem:[%s315_s0] sm:$0xff]  ;;  %v31_v3 = vld [vmem:[#allocation2 + $0x18] sm:$0xff]  ;;  %v29_v4 = vld [vmem:[#allocation2 + $0x8] sm:$0xff]  ;;  %s278_s0 = smov 64   ;;  %s279_s1 = smov 12   ;;  %vm218_vm10 = vcmask 7168  }
   0x7   :  { %77 = vmatpush.msra.mxu1 %v31_v3  ;;  %v33_v5 = vld [vmem:[#allocation2 + $0x60] ss:$8 sm:$0x3]  ;;  %v116_v10 = vld [vmem:[#allocation2 + $0x50] sm:$0xff]  ;;  %v117_v11 = vld [vmem:[#allocation2 + $0x58] sm:$0xff]  ;;  %s280_s18 = smov 116  }
   0x8   :  { %58 = vmatpush.msra.mxu0 %v28_v1  ;;  %v35_v6 = vperm.slane %v33_v5, 0  ;;  %v114_v12 = vld [vmem:[#allocation2 + $0x40] sm:$0xff]  ;;  %141 = vmatpush.msra.mxu2 %v116_v10  ;;  %v115_v13 = vld [vmem:[#allocation2 + $0x48] sm:$0xff]  ;;  %v112_v26 = vld [vmem:[#allocation2 + $0x30] sm:$0xff]  ;;  %v36_v30 = vperm.slane %v33_v5, 1 }
   0x9   :  { %225 = vmatmul.msk.f32.vlgmr.msra.gmra.mxu0 %vm39_vm0, %v302_v2  ;;  %78 = vmatpush.msra.mxu1 %v29_v4  ;;  %v113_v27 = vld [vmem:[#allocation2 + $0x38] sm:$0xff]  ;;  %v110_v28 = vld [vmem:[#allocation2 + $0x20] sm:$0xff]  ;;  %v111_v29 = vld [vmem:[#allocation2 + $0x28] sm:$0xff] }
   0xa   :  { %226 = vmatmul.msk.f32.vlgmr.msra.gmra.mxu1 %vm39_vm0, %v302_v2  ;;  %161 = vmatpush.msra.mxu3 %v117_v11  ;;  %v102_v32 = vld [vmem:[#allocation2 + $0x61] ss:$0 sm:$0xff]  ;;  %v119_v40 = vld [vmem:[#allocation2 + $0x70] ss:$8 sm:$0x3] }
   0xb   :  { %142 = vmatpush.msra.mxu2 %v114_v12  ;;  %v121_v41 = vperm.slane %v119_v40, 0  ;;  %v197_v45 = vld [vmem:[#allocation2 + $0x81] ss:$0 sm:$0xff]  ;;  %v198_v58 = vld [vmem:[#allocation2 + $0x82] ss:$0 sm:$0xff]  ;;  %v122_v60 = vperm.slane %v119_v40, 1 }
   0xc   :  { %162 = vmatpush.msra.mxu3 %v115_v13  ;;  %204 = vrot.lane.b32.xlu1 %v197_v45, %s279_s1  ;;  %v188_v59 = vld [vmem:[#allocation2 + $0x71] ss:$0 sm:$0xff]  ;;  %v196_v5 = vld [vmem:[#allocation2 + $0x80] ss:$0 sm:$0xff] }
   0xd   :  { %143 = vmatpush.msra.mxu2 %v112_v26  ;;  %210 = vrot.lane.b32.xlu2 %v198_v58, %s279_s1 }
   0xe   :  { %163 = vmatpush.msra.mxu3 %v113_v27 }
   0xf   :  { %144 = vmatpush.msra.mxu2 %v110_v28 }
  0x10   :  { %164 = vmatpush.msra.mxu3 %v111_v29 }
  0x67   :  { %v211_v12 = vpop.permute.xlu2 %210 }
  0x86   :  { %v60_v7 = vpop.f32.mrf.mxu0 }
  0x87   :  { %v61_v8 = vadd.f32 %v60_v7, %v35_v6  ;;  %v80_v31 = vpop.f32.mrf.mxu1 }
  0x88   :  { %v81_v33 = vadd.f32 %v80_v31, %v36_v30 }
  0x89   :  { %v227_v9 = vmul.f32 -1.442695, %v61_v8 }
  0x8b   :  { %237 = vpow2.f32 %v227_v9  ;;  %v205_v9 = vpop.permute.xlu1 %204 }
  0x8c   :  { %v207_v10 = vmul.f32 %v205_v9, %v302_v2 }
  0x91   :  { %v238_v14 = vpop.eup %237 }
  0x92   :  { %v86_v15 = vadd.f32 1.0, %v238_v14 }
  0x94   :  { %239 = vrcp.f32 %v86_v15  ;;  %v98_v19 = vand.u32 2147483648, %v86_v15  ;;  %v96_v21 = vand.u32 2147483647, %v86_v15  ;;  %vm92_vm2 = vweird.f32 %v86_v15 }
  0x96   :  { %v99_v23 = vor.u32 1.1754944e-38, %v98_v19  ;;  %vm97_vm4 = vcmp.eq.f32.partialorder %v96_v21, 8.507059e+37 }
  0x9a   :  { %v240_v16 = vpop.eup %239 }
  0x9b   :  { %v88_v17 = vmul.f32 %v240_v16, %v86_v15  ;;  %vm93_vm1 = vweird.f32 %v240_v16 }
  0x9c   :  { %vm94_vm3 = vmor %vm92_vm2, %vm93_vm1 }
  0x9d   :  { %v89_v18 = vsub.f32 1.0, %v88_v17 }
  0x9f   :  { %v90_v20 = vmul.f32 %v240_v16, %v89_v18 }
  0xa1   :  { %v91_v22 = vadd.f32 %v240_v16, %v90_v20 }
  0xa3   :  { %v95_v24 = vsel %vm94_vm3, %v240_v16, %v91_v22 }
  0xa4   :  { %v100_v25 = vsel %vm97_vm4, %v99_v23, %v95_v24 }
  0xa5   :  { %106 = vrot.lane.b32.xlu0 %v100_v25, %s278_s0  ;;  %v103_v34 = vmul.f32 %v102_v32, %v100_v25 }
  0xa7   :  { %v104_v35 = vadd.f32 %v103_v34, %v81_v33 }
  0xa9   :  { %241 = vtanh.f32 %v104_v35 }
  0xaf   :  { %v242_v38 = vpop.eup %241 }
 0x117   :  { %v107_v36 = vpop.permute.xlu0 %106 }
 0x118   :  { %v108_v37 = vsub.f32 1.0, %v107_v36 }
 0x11a   :  { %v109_v39 = vmul.f32 %v242_v38, %v108_v37 }
 0x11c   :  { %228 = vmatmul.msk.f32.vlgmr.msra.gmra.mxu2 %vm125_vm5, %v109_v39  ;;  %229 = vmatmul.msk.f32.vlgmr.msra.gmra.mxu3 %vm125_vm5, %v109_v39 }
 0x19f   :  { %v146_v42 = vpop.f32.mrf.mxu2  ;;  %v166_v61 = vpop.f32.mrf.mxu3 }
 0x1a0   :  { %v147_v43 = vadd.f32 %v146_v42, %v121_v41  ;;  %v167_v63 = vadd.f32 %v166_v61, %v122_v60 }
 0x1a2   :  { %v230_v44 = vmul.f32 -1.442695, %v147_v43 }
 0x1a4   :  { %243 = vpow2.f32 %v230_v44 }
 0x1aa   :  { %v244_v46 = vpop.eup %243 }
 0x1ab   :  { %v172_v47 = vadd.f32 1.0, %v244_v46 }
 0x1ad   :  { %245 = vrcp.f32 %v172_v47  ;;  %v184_v51 = vand.u32 2147483648, %v172_v47  ;;  %v182_v53 = vand.u32 2147483647, %v172_v47  ;;  %vm178_vm7 = vweird.f32 %v172_v47 }
 0x1af   :  { %v185_v55 = vor.u32 1.1754944e-38, %v184_v51  ;;  %vm183_vm9 = vcmp.eq.f32.partialorder %v182_v53, 8.507059e+37 }
 0x1b3   :  { %v246_v48 = vpop.eup %245 }
 0x1b4   :  { %v174_v49 = vmul.f32 %v246_v48, %v172_v47  ;;  %vm179_vm6 = vweird.f32 %v246_v48 }
 0x1b5   :  { %vm180_vm8 = vmor %vm178_vm7, %vm179_vm6 }
 0x1b6   :  { %v175_v50 = vsub.f32 1.0, %v174_v49 }
 0x1b8   :  { %v176_v52 = vmul.f32 %v246_v48, %v175_v50 }
 0x1ba   :  { %v177_v54 = vadd.f32 %v246_v48, %v176_v52 }
 0x1bc   :  { %v181_v56 = vsel %vm180_vm8, %v246_v48, %v177_v54 }
 0x1bd   :  { %v186_v57 = vsel %vm183_vm9, %v185_v55, %v181_v56 }
 0x1be   :  { %192 = vrot.lane.b32.xlu0 %v186_v57, %s278_s0  ;;  %v189_v62 = vmul.f32 %v188_v59, %v186_v57 }
 0x1c0   :  { %v190_v0 = vadd.f32 %v189_v62, %v167_v63 }
 0x1c2   :  { %247 = vtanh.f32 %v190_v0 }
 0x1c8   :  { %v248_v4 = vpop.eup %247 }
 0x230   :  { %v193_v1 = vpop.permute.xlu0 %192 }
 0x231   :  { %v194_v3 = vsub.f32 1.0, %v193_v1 }
 0x233   :  { %v195_v6 = vmul.f32 %v248_v4, %v194_v3 }
 0x235   :  { %v199_v7 = vmul.f32 %v196_v5, %v195_v6 }
 0x237   :  { %v200_v8 = vsel %vm125_vm5, %v199_v7, 0.0 }
 0x238   :  { %201 = vadd.xlane.f32.xlu1 %v200_v8 }
 0x2ab   :  { %v202_v11 = vpop.xlane.xlu1 %201 }
 0x2ac   :  { %v208_v13 = vadd.f32 %v207_v10, %v202_v11 }
 0x2ae   :  { %v213_v14 = vadd.f32 %v211_v12, %v208_v13 }
 0x2b0   :  { %215 = vrot.lane.b32.xlu2 %v213_v14, %s280_s18 }
 0x30a   :  { %v216_v15 = vpop.permute.xlu2 %215 }
 0x30b   :  { %219 = vst.msk [vmem:[%s317_s2] sm:$0xff] %vm218_vm10, %v216_v15 }
 0x30c   :  { %224 = vsyncpa [#allocation3], 1 }

</bundles_post_ra>
